<compile_context>
chip_gen: v7x
topology: tpu7x:2x2x1
jax: 0.10.0
libtpu: 0.0.40
codegen_flags: <defaults>
</compile_context>

<pallas_src>
import math

import jax
import jax.numpy as jnp
from jax import lax
from jax.experimental import pallas as pl
from jax.experimental.pallas import tpu as pltpu

# ---- module hyper-parameters (small synthetic configuration) ----------------
BATCH = 2
SEQ = 8
DIM = 32
HEADS = 4
DIM_HEAD = 16
INNER = HEADS * DIM_HEAD          # 64
QKV_OUT = INNER + 2 * DIM_HEAD    # 96 (fused to_q + to_kv output width)
SCALE = 16.0                      # cosine_sim_scale
SQRT_SCALE = math.sqrt(SCALE)
LN_EPS = 1e-5                     # LayerNorm eps for fp32 inputs
L2_EPS = 1e-12                    # F.normalize eps

KV_LEN = SEQ + 1                  # 9  (null k/v + SEQ keys)
KV_PAD = 16                       # padded to a clean sublane multiple
FLAT = HEADS * SEQ                # 32 (heads folded onto the sublane axis)


# ---- shared math helpers -----------------------------------------------------
def _layernorm(x, g, eps):
    mean = jnp.mean(x, axis=-1, keepdims=True)
    var = jnp.mean((x - mean) ** 2, axis=-1, keepdims=True)   # unbiased=False
    return (x - mean) * lax.rsqrt(var + eps) * g


def _l2norm_rsqrt(x):
    # kernel-side l2norm: x * rsqrt(max(sum(x^2), eps^2)) -> keeps sqrt/div on EUP
    ss = jnp.sum(x * x, axis=-1, keepdims=True)
    return x * lax.rsqrt(jnp.maximum(ss, L2_EPS * L2_EPS))


def _l2norm_ref(x):
    # reference-side l2norm, mirroring F.normalize exactly
    n = jnp.sqrt(jnp.sum(x * x, axis=-1, keepdims=True))
    return x / jnp.maximum(n, L2_EPS)


# ---- Pallas kernel: one batch element per grid step (parallel on v7x) --------
def attention_kernel(x_ref, wqkv_ref, wout_ref, g1_ref, g2_ref, nullkv_ref,
                     o_ref):
    x = x_ref[0]                               # (SEQ, DIM)
    g1 = g1_ref[0]                             # (DIM,)
    g2 = g2_ref[0]                             # (DIM,)

    # pre-attention LayerNorm
    xn = _layernorm(x, g1, LN_EPS)

    # fused q/kv projection: single (SEQ, DIM) @ (DIM, 96) MXU op
    qkv = jnp.dot(xn, wqkv_ref[...], preferred_element_type=jnp.float32)
    q = qkv[:, :INNER]                         # (SEQ, INNER)
    k = qkv[:, INNER:INNER + DIM_HEAD]         # (SEQ, DIM_HEAD)
    v = qkv[:, INNER + DIM_HEAD:]              # (SEQ, DIM_HEAD)
    # NOTE: torch's `q = q * scale` is dropped — exactly cancelled by l2norm
    # (scale = 16 is a power of two, so the cancellation is bit-exact).

    # prepend learned null key/value, pad to a full 16-sublane tile
    nk = nullkv_ref[0:1, :]                    # (1, DIM_HEAD)
    nv = nullkv_ref[1:2, :]
    zpad = jnp.zeros((KV_PAD - KV_LEN, DIM_HEAD), jnp.float32)
    k_full = jnp.concatenate([nk, k, zpad], axis=0)   # (KV_PAD, DIM_HEAD)
    v_full = jnp.concatenate([nv, v, zpad], axis=0)   # (KV_PAD, DIM_HEAD)

    # fold heads onto the sublane axis: (SEQ, INNER) -> (HEADS*SEQ, DIM_HEAD)
    q_flat = jnp.concatenate(
        [q[:, h * DIM_HEAD:(h + 1) * DIM_HEAD] for h in range(HEADS)], axis=0)

    # cosine-sim attention — one l2norm each, ONE sim matmul, ONE softmax,
    # ONE PV matmul for all heads.
    q_flat = _l2norm_rsqrt(q_flat) * SQRT_SCALE
    k_full = _l2norm_rsqrt(k_full) * SQRT_SCALE

    sim = lax.dot_general(q_flat, k_full, (((1,), (1,)), ((), ())),
                          preferred_element_type=jnp.float32)  # (FLAT, KV_PAD)
    col = lax.broadcasted_iota(jnp.int32, sim.shape, 1)
    sim = jnp.where(col < KV_LEN, sim, -1e30)        # mask padding columns
    sim = sim - jnp.max(sim, axis=-1, keepdims=True)
    p = jnp.exp(sim)
    # exact f32 divide (the approximate EUP reciprocal previously used here
    # introduced ~7e-3 absolute error after the output LayerNorm).
    attn = p / jnp.sum(p, axis=-1, keepdims=True)
    out_flat = jnp.dot(attn, v_full,
                       preferred_element_type=jnp.float32)     # (FLAT, DIM_HEAD)

    # un-fold heads: (HEADS*SEQ, DIM_HEAD) -> (SEQ, INNER)
    out = jnp.concatenate(
        [out_flat[h * SEQ:(h + 1) * SEQ, :] for h in range(HEADS)], axis=1)

    # output projection + LayerNorm
    out = jnp.dot(out, wout_ref[...], preferred_element_type=jnp.float32)
    o_ref[0] = _layernorm(out, g2, LN_EPS)
    # TODO(synk): optional `mask` / `attn_bias` / causal / dropout branches not
    # wired (module defaults are None / False / 0.0, so the default forward is exact).


def attention_forward(x, wq, wkv, wout, g1, g2, null_kv):
    b, n, d = x.shape
    wqkv = jnp.concatenate([wq, wkv], axis=1)          # (DIM, 96) fused projection
    return pl.pallas_call(
        attention_kernel,
        out_shape=jax.ShapeDtypeStruct((b, n, d), x.dtype),
        grid_spec=pltpu.PrefetchScalarGridSpec(
            num_scalar_prefetch=0,
            grid=(b,),
            in_specs=[
                pl.BlockSpec((1, n, d), lambda i: (i, 0, 0)),      # x
                pl.BlockSpec(wqkv.shape, lambda i: (0, 0)),        # fused to_q|to_kv
                pl.BlockSpec(wout.shape, lambda i: (0, 0)),        # to_out weight
                pl.BlockSpec(g1.shape, lambda i: (0, 0)),          # norm.g
                pl.BlockSpec(g2.shape, lambda i: (0, 0)),          # out norm g
                pl.BlockSpec(null_kv.shape, lambda i: (0, 0)),     # null_kv
            ],
            out_specs=pl.BlockSpec((1, n, d), lambda i: (i, 0, 0)),
        ),
        compiler_params=pltpu.CompilerParams(
            dimension_semantics=("parallel",)),        # batch elems are independent
    )(x, wqkv, wout, g1, g2, null_kv)


# ---- pure-JAX reference (mirrors the PyTorch forward exactly) ----------------
def attention_reference(x, wq, wkv, wout, g1, g2, null_kv):
    b, n, _ = x.shape
    xn = _layernorm(x, g1[0], LN_EPS)
    q = xn @ wq                                               # (b, n, INNER)
    kv = xn @ wkv                                             # (b, n, 2*DIM_HEAD)
    k, v = kv[..., :DIM_HEAD], kv[..., DIM_HEAD:]
    q = q.reshape(b, n, HEADS, DIM_HEAD).transpose(0, 2, 1, 3)  # (b, h, n, d)
    q = q * SCALE
    nk = jnp.broadcast_to(null_kv[0], (b, 1, DIM_HEAD))
    nv = jnp.broadcast_to(null_kv[1], (b, 1, DIM_HEAD))
    k = jnp.concatenate([nk, k], axis=1)
    v = jnp.concatenate([nv, v], axis=1)
    q, k = _l2norm_ref(q) * SQRT_SCALE, _l2norm_ref(k) * SQRT_SCALE
    sim = jnp.einsum('bhid,bjd->bhij', q, k)
    attn = jax.nn.softmax(sim.astype(jnp.float32), axis=-1).astype(sim.dtype)
    out = jnp.einsum('bhij,bjd->bhid', attn, v)
    out = out.transpose(0, 2, 1, 3).reshape(b, n, INNER)
    out = out @ wout
    return _layernorm(out, g2[0], LN_EPS)


if __name__ == "__main__":
    key = jax.random.PRNGKey(0)
    kx, kq, kkv, ko, knull, kg = jax.random.split(key, 6)

    x = jax.random.normal(kx, (BATCH, SEQ, DIM), dtype=jnp.float32)

    # deterministic synthetic parameters (nn.Linear-like scale: 1/sqrt(fan_in))
    wq = jax.random.normal(kq, (DIM, INNER), dtype=jnp.float32) / math.sqrt(DIM)
    wkv = jax.random.normal(kkv, (DIM, 2 * DIM_HEAD), dtype=jnp.float32) / math.sqrt(DIM)
    wout = jax.random.normal(ko, (INNER, DIM), dtype=jnp.float32) / math.sqrt(INNER)
    null_kv = jax.random.normal(knull, (2, DIM_HEAD), dtype=jnp.float32)
    # LayerNorm gains initialized to ones (plus a tiny deterministic perturbation
    # so the gain multiply is actually exercised)
    g1 = (jnp.ones((1, DIM), jnp.float32)
          + 0.01 * jax.random.normal(kg, (1, DIM), dtype=jnp.float32))
    g2 = jnp.ones((1, DIM), jnp.float32)

    out = attention_forward(x, wq, wkv, wout, g1, g2, null_kv)
    out = jax.block_until_ready(out)

    ref = attention_reference(x, wq, wkv, wout, g1, g2, null_kv)
    assert out.shape == (BATCH, SEQ, DIM)
    # exact-softmax kernel: agreement is limited only by f32 accumulation order,
    # so a tight tolerance holds.
    assert jnp.allclose(out, ref, atol=1e-3, rtol=1e-3), (
        f"max abs err = {jnp.max(jnp.abs(out - ref))}")

    print("KERNEL_OK")
</pallas_src>

<mosaic_0001>
module attributes {stable_mosaic.version = 11 : i64} {
  func.func @attention_kernel(%arg0: i32, %arg1: memref<1x8x32xf32, #tpu.memory_space<vmem>>, %arg2: memref<32x96xf32, #tpu.memory_space<vmem>>, %arg3: memref<64x32xf32, #tpu.memory_space<vmem>>, %arg4: memref<1x32xf32, #tpu.memory_space<vmem>>, %arg5: memref<1x32xf32, #tpu.memory_space<vmem>>, %arg6: memref<2x16xf32, #tpu.memory_space<vmem>>, %arg7: memref<1x8x32xf32, #tpu.memory_space<vmem>>) attributes {dimension_semantics = [#tpu.dimension_semantics<parallel>], iteration_bounds = array<i64: 2>, scalar_prefetch = 0 : i64, scratch_operands = 0 : i64, tpu.core_type = #tpu.core_type<tc>, window_params = [{transform_indices = @transform_0, window_bounds = array<i64: 1, 8, 32>}, {pipeline_mode = #tpu.pipeline_mode<synchronous>, transform_indices = @transform_1, window_bounds = array<i64: 32, 96>}, {pipeline_mode = #tpu.pipeline_mode<synchronous>, transform_indices = @transform_2, window_bounds = array<i64: 64, 32>}, {pipeline_mode = #tpu.pipeline_mode<synchronous>, transform_indices = @transform_3, window_bounds = array<i64: 1, 32>}, {pipeline_mode = #tpu.pipeline_mode<synchronous>, transform_indices = @transform_4, window_bounds = array<i64: 1, 32>}, {pipeline_mode = #tpu.pipeline_mode<synchronous>, transform_indices = @transform_5, window_bounds = array<i64: 2, 16>}, {transform_indices = @transform_6, window_bounds = array<i64: 1, 8, 32>}]} {
    %c0 = arith.constant 0 : index
    %c0_0 = arith.constant 0 : index
    %c0_1 = arith.constant 0 : index
    %0 = vector.load %arg1[%c0, %c0_0, %c0_1] : memref<1x8x32xf32, #tpu.memory_space<vmem>>, vector<1x8x32xf32>
    %1 = vector.shape_cast %0 : vector<1x8x32xf32> to vector<8x32xf32>
    %c0_2 = arith.constant 0 : index
    %c0_3 = arith.constant 0 : index
    %2 = vector.load %arg4[%c0_2, %c0_3] : memref<1x32xf32, #tpu.memory_space<vmem>>, vector<1x32xf32>
    %3 = vector.shape_cast %2 : vector<1x32xf32> to vector<32xf32>
    %c0_4 = arith.constant 0 : index
    %c0_5 = arith.constant 0 : index
    %4 = vector.load %arg5[%c0_4, %c0_5] : memref<1x32xf32, #tpu.memory_space<vmem>>, vector<1x32xf32>
    %5 = vector.shape_cast %4 : vector<1x32xf32> to vector<32xf32>
    %cst = arith.constant dense<0.000000e+00> : vector<8xf32>
    %6 = vector.multi_reduction <add>, %1, %cst [1] : vector<8x32xf32> to vector<8xf32>
    %7 = vector.shape_cast %6 : vector<8xf32> to vector<8x1xf32>
    %cst_6 = arith.constant 3.200000e+01 : f32
    %8 = vector.broadcast %cst_6 : f32 to vector<8x1xf32>
    %9 = arith.divf %7, %8 : vector<8x1xf32>
    %10 = vector.broadcast %9 : vector<8x1xf32> to vector<8x32xf32>
    %11 = arith.subf %1, %10 : vector<8x32xf32>
    %12 = arith.mulf %11, %11 : vector<8x32xf32>
    %cst_7 = arith.constant dense<0.000000e+00> : vector<8xf32>
    %13 = vector.multi_reduction <add>, %12, %cst_7 [1] : vector<8x32xf32> to vector<8xf32>
    %14 = vector.shape_cast %13 : vector<8xf32> to vector<8x1xf32>
    %cst_8 = arith.constant 3.200000e+01 : f32
    %15 = vector.broadcast %cst_8 : f32 to vector<8x1xf32>
    %16 = arith.divf %14, %15 : vector<8x1xf32>
    %17 = vector.broadcast %9 : vector<8x1xf32> to vector<8x32xf32>
    %18 = arith.subf %1, %17 : vector<8x32xf32>
    %cst_9 = arith.constant 9.99999974E-6 : f32
    %19 = vector.broadcast %cst_9 : f32 to vector<8x1xf32>
    %20 = arith.addf %16, %19 : vector<8x1xf32>
    %21 = math.rsqrt %20 : vector<8x1xf32>
    %22 = vector.broadcast %21 : vector<8x1xf32> to vector<8x32xf32>
    %23 = arith.mulf %18, %22 : vector<8x32xf32>
    %24 = vector.shape_cast %3 : vector<32xf32> to vector<1x32xf32>
    %25 = vector.broadcast %24 : vector<1x32xf32> to vector<8x32xf32>
    %26 = arith.mulf %23, %25 : vector<8x32xf32>
    %c0_10 = arith.constant 0 : index
    %c0_11 = arith.constant 0 : index
    %27 = vector.load %arg2[%c0_10, %c0_11] : memref<32x96xf32, #tpu.memory_space<vmem>>, vector<32x96xf32>
    %cst_12 = arith.constant dense<0.000000e+00> : vector<8x96xf32>
    %28 = tpu.matmul %26, %27, %cst_12 {dimension_numbers = #tpu.dot_dimension_numbers<[1], [0], [0], [1], [0, 0, 1, 1], [], []>} : vector<8x32xf32>, vector<32x96xf32>, vector<8x96xf32> -> vector<8x96xf32>
    %29 = vector.extract_strided_slice %28 {offsets = [0, 0], sizes = [8, 64], strides = [1, 1]} : vector<8x96xf32> to vector<8x64xf32>
    %30 = vector.extract_strided_slice %28 {offsets = [0, 64], sizes = [8, 16], strides = [1, 1]} : vector<8x96xf32> to vector<8x16xf32>
    %31 = vector.extract_strided_slice %28 {offsets = [0, 80], sizes = [8, 16], strides = [1, 1]} : vector<8x96xf32> to vector<8x16xf32>
    %c0_13 = arith.constant 0 : index
    %c0_14 = arith.constant 0 : index
    %32 = vector.load %arg6[%c0_13, %c0_14] : memref<2x16xf32, #tpu.memory_space<vmem>>, vector<1x16xf32>
    %c1 = arith.constant 1 : index
    %c0_15 = arith.constant 0 : index
    %33 = vector.load %arg6[%c1, %c0_15] : memref<2x16xf32, #tpu.memory_space<vmem>>, vector<1x16xf32>
    %cst_16 = arith.constant 0.000000e+00 : f32
    %34 = vector.broadcast %cst_16 : f32 to vector<7x16xf32>
    %35 = tpu.concatenate %32, %30, %34 in 0 : vector<1x16xf32>, vector<8x16xf32>, vector<7x16xf32> -> vector<16x16xf32>
    %36 = tpu.concatenate %33, %31, %34 in 0 : vector<1x16xf32>, vector<8x16xf32>, vector<7x16xf32> -> vector<16x16xf32>
    %37 = vector.extract_strided_slice %29 {offsets = [0, 0], sizes = [8, 16], strides = [1, 1]} : vector<8x64xf32> to vector<8x16xf32>
    %38 = vector.extract_strided_slice %29 {offsets = [0, 16], sizes = [8, 16], strides = [1, 1]} : vector<8x64xf32> to vector<8x16xf32>
    %39 = vector.extract_strided_slice %29 {offsets = [0, 32], sizes = [8, 16], strides = [1, 1]} : vector<8x64xf32> to vector<8x16xf32>
    %40 = vector.extract_strided_slice %29 {offsets = [0, 48], sizes = [8, 16], strides = [1, 1]} : vector<8x64xf32> to vector<8x16xf32>
    %41 = tpu.concatenate %37, %38, %39, %40 in 0 : vector<8x16xf32>, vector<8x16xf32>, vector<8x16xf32>, vector<8x16xf32> -> vector<32x16xf32>
    %42 = arith.mulf %41, %41 : vector<32x16xf32>
    %cst_17 = arith.constant dense<0.000000e+00> : vector<32xf32>
    %43 = vector.multi_reduction <add>, %42, %cst_17 [1] : vector<32x16xf32> to vector<32xf32>
    %44 = vector.shape_cast %43 : vector<32xf32> to vector<32x1xf32>
    %cst_18 = arith.constant 1.000000e-24 : f32
    %45 = vector.broadcast %cst_18 : f32 to vector<32x1xf32>
    %46 = arith.maximumf %44, %45 : vector<32x1xf32>
    %47 = math.rsqrt %46 : vector<32x1xf32>
    %48 = vector.broadcast %47 : vector<32x1xf32> to vector<32x16xf32>
    %49 = arith.mulf %41, %48 : vector<32x16xf32>
    %cst_19 = arith.constant 4.000000e+00 : f32
    %50 = vector.broadcast %cst_19 : f32 to vector<32x16xf32>
    %51 = arith.mulf %49, %50 : vector<32x16xf32>
    %52 = arith.mulf %35, %35 : vector<16x16xf32>
    %cst_20 = arith.constant dense<0.000000e+00> : vector<16xf32>
    %53 = vector.multi_reduction <add>, %52, %cst_20 [1] : vector<16x16xf32> to vector<16xf32>
    %54 = vector.shape_cast %53 : vector<16xf32> to vector<16x1xf32>
    %cst_21 = arith.constant 1.000000e-24 : f32
    %55 = vector.broadcast %cst_21 : f32 to vector<16x1xf32>
    %56 = arith.maximumf %54, %55 : vector<16x1xf32>
    %57 = math.rsqrt %56 : vector<16x1xf32>
    %58 = vector.broadcast %57 : vector<16x1xf32> to vector<16x16xf32>
    %59 = arith.mulf %35, %58 : vector<16x16xf32>
    %cst_22 = arith.constant 4.000000e+00 : f32
    %60 = vector.broadcast %cst_22 : f32 to vector<16x16xf32>
    %61 = arith.mulf %59, %60 : vector<16x16xf32>
    %cst_23 = arith.constant dense<0.000000e+00> : vector<32x16xf32>
    %62 = tpu.matmul %51, %61, %cst_23 {dimension_numbers = #tpu.dot_dimension_numbers<[1], [1], [0], [0], [0, 0, 1, 0], [], []>} : vector<32x16xf32>, vector<16x16xf32>, vector<32x16xf32> -> vector<32x16xf32>
    %63 = tpu.iota {dimensions = array<i32: 1>} : vector<32x16xi32>
    %c9_i32 = arith.constant 9 : i32
    %64 = vector.broadcast %c9_i32 : i32 to vector<32x16xi32>
    %65 = arith.cmpi slt, %63, %64 : vector<32x16xi32>
    %cst_24 = arith.constant -1.000000e+30 : f32
    %66 = vector.broadcast %cst_24 : f32 to vector<32x16xf32>
    %67 = arith.select %65, %62, %66 : vector<32x16xi1>, vector<32x16xf32>
    %cst_25 = arith.constant dense<0xFF800000> : vector<32xf32>
    %68 = vector.multi_reduction <maximumf>, %67, %cst_25 [1] : vector<32x16xf32> to vector<32xf32>
    %69 = vector.shape_cast %68 : vector<32xf32> to vector<32x1xf32>
    %70 = vector.broadcast %69 : vector<32x1xf32> to vector<32x16xf32>
    %71 = arith.subf %67, %70 : vector<32x16xf32>
    %72 = math.exp %71 : vector<32x16xf32>
    %cst_26 = arith.constant dense<0.000000e+00> : vector<32xf32>
    %73 = vector.multi_reduction <add>, %72, %cst_26 [1] : vector<32x16xf32> to vector<32xf32>
    %74 = vector.shape_cast %73 : vector<32xf32> to vector<32x1xf32>
    %75 = vector.broadcast %74 : vector<32x1xf32> to vector<32x16xf32>
    %76 = arith.divf %72, %75 : vector<32x16xf32>
    %cst_27 = arith.constant dense<0.000000e+00> : vector<32x16xf32>
    %77 = tpu.matmul %76, %36, %cst_27 {dimension_numbers = #tpu.dot_dimension_numbers<[1], [0], [0], [1], [0, 0, 1, 1], [], []>} : vector<32x16xf32>, vector<16x16xf32>, vector<32x16xf32> -> vector<32x16xf32>
    %78 = vector.extract_strided_slice %77 {offsets = [0, 0], sizes = [8, 16], strides = [1, 1]} : vector<32x16xf32> to vector<8x16xf32>
    %79 = vector.extract_strided_slice %77 {offsets = [8, 0], sizes = [8, 16], strides = [1, 1]} : vector<32x16xf32> to vector<8x16xf32>
    %80 = vector.extract_strided_slice %77 {offsets = [16, 0], sizes = [8, 16], strides = [1, 1]} : vector<32x16xf32> to vector<8x16xf32>
    %81 = vector.extract_strided_slice %77 {offsets = [24, 0], sizes = [8, 16], strides = [1, 1]} : vector<32x16xf32> to vector<8x16xf32>
    %82 = tpu.concatenate %78, %79, %80, %81 in 1 : vector<8x16xf32>, vector<8x16xf32>, vector<8x16xf32>, vector<8x16xf32> -> vector<8x64xf32>
    %c0_28 = arith.constant 0 : index
    %c0_29 = arith.constant 0 : index
    %83 = vector.load %arg3[%c0_28, %c0_29] : memref<64x32xf32, #tpu.memory_space<vmem>>, vector<64x32xf32>
    %cst_30 = arith.constant dense<0.000000e+00> : vector<8x32xf32>
    %84 = tpu.matmul %82, %83, %cst_30 {dimension_numbers = #tpu.dot_dimension_numbers<[1], [0], [0], [1], [0, 0, 1, 1], [], []>} : vector<8x64xf32>, vector<64x32xf32>, vector<8x32xf32> -> vector<8x32xf32>
    %cst_31 = arith.constant dense<0.000000e+00> : vector<8xf32>
    %85 = vector.multi_reduction <add>, %84, %cst_31 [1] : vector<8x32xf32> to vector<8xf32>
    %86 = vector.shape_cast %85 : vector<8xf32> to vector<8x1xf32>
    %cst_32 = arith.constant 3.200000e+01 : f32
    %87 = vector.broadcast %cst_32 : f32 to vector<8x1xf32>
    %88 = arith.divf %86, %87 : vector<8x1xf32>
    %89 = vector.broadcast %88 : vector<8x1xf32> to vector<8x32xf32>
    %90 = arith.subf %84, %89 : vector<8x32xf32>
    %91 = arith.mulf %90, %90 : vector<8x32xf32>
    %cst_33 = arith.constant dense<0.000000e+00> : vector<8xf32>
    %92 = vector.multi_reduction <add>, %91, %cst_33 [1] : vector<8x32xf32> to vector<8xf32>
    %93 = vector.shape_cast %92 : vector<8xf32> to vector<8x1xf32>
    %cst_34 = arith.constant 3.200000e+01 : f32
    %94 = vector.broadcast %cst_34 : f32 to vector<8x1xf32>
    %95 = arith.divf %93, %94 : vector<8x1xf32>
    %96 = vector.broadcast %88 : vector<8x1xf32> to vector<8x32xf32>
    %97 = arith.subf %84, %96 : vector<8x32xf32>
    %cst_35 = arith.constant 9.99999974E-6 : f32
    %98 = vector.broadcast %cst_35 : f32 to vector<8x1xf32>
    %99 = arith.addf %95, %98 : vector<8x1xf32>
    %100 = math.rsqrt %99 : vector<8x1xf32>
    %101 = vector.broadcast %100 : vector<8x1xf32> to vector<8x32xf32>
    %102 = arith.mulf %97, %101 : vector<8x32xf32>
    %103 = vector.shape_cast %5 : vector<32xf32> to vector<1x32xf32>
    %104 = vector.broadcast %103 : vector<1x32xf32> to vector<8x32xf32>
    %105 = arith.mulf %102, %104 : vector<8x32xf32>
    %c0_36 = arith.constant 0 : index
    %c0_37 = arith.constant 0 : index
    %c0_38 = arith.constant 0 : index
    %106 = vector.load %arg7[%c0_36, %c0_37, %c0_38] : memref<1x8x32xf32, #tpu.memory_space<vmem>>, vector<1x8x32xf32>
    %107 = vector.shape_cast %106 : vector<1x8x32xf32> to vector<8x32xf32>
    %108 = vector.shape_cast %105 : vector<8x32xf32> to vector<1x8x32xf32>
    tpu.vector_store %arg7[%c0_36, %c0_37, %c0_38], %108 {strides = array<i32>} : memref<1x8x32xf32, #tpu.memory_space<vmem>>, vector<1x8x32xf32>,
    return
  }
  func.func @transform_0(%arg0: i32) -> (i32, i32, i32) {
    %c0_i32 = arith.constant 0 : i32
    %c0_i32_0 = arith.constant 0 : i32
    %c0_i32_1 = arith.constant 0 : i32
    return %arg0, %c0_i32, %c0_i32_0 : i32, i32, i32
  }
  func.func @transform_1(%arg0: i32) -> (i32, i32) {
    %c0_i32 = arith.constant 0 : i32
    %c0_i32_0 = arith.constant 0 : i32
    %c0_i32_1 = arith.constant 0 : i32
    return %c0_i32, %c0_i32_0 : i32, i32
  }
  func.func @transform_2(%arg0: i32) -> (i32, i32) {
    %c0_i32 = arith.constant 0 : i32
    %c0_i32_0 = arith.constant 0 : i32
    %c0_i32_1 = arith.constant 0 : i32
    return %c0_i32, %c0_i32_0 : i32, i32
  }
  func.func @transform_3(%arg0: i32) -> (i32, i32) {
    %c0_i32 = arith.constant 0 : i32
    %c0_i32_0 = arith.constant 0 : i32
    %c0_i32_1 = arith.constant 0 : i32
    return %c0_i32, %c0_i32_0 : i32, i32
  }
  func.func @transform_4(%arg0: i32) -> (i32, i32) {
    %c0_i32 = arith.constant 0 : i32
    %c0_i32_0 = arith.constant 0 : i32
    %c0_i32_1 = arith.constant 0 : i32
    return %c0_i32, %c0_i32_0 : i32, i32
  }
  func.func @transform_5(%arg0: i32) -> (i32, i32) {
    %c0_i32 = arith.constant 0 : i32
    %c0_i32_0 = arith.constant 0 : i32
    %c0_i32_1 = arith.constant 0 : i32
    return %c0_i32, %c0_i32_0 : i32, i32
  }
  func.func @transform_6(%arg0: i32) -> (i32, i32, i32) {
    %c0_i32 = arith.constant 0 : i32
    %c0_i32_0 = arith.constant 0 : i32
    %c0_i32_1 = arith.constant 0 : i32
    return %arg0, %c0_i32, %c0_i32_0 : i32, i32, i32
  }
}

</mosaic_0001>

<bundles_post_ra>
// kernel: tpu_custom_call.1
= control target key start
LH: loop header
LB: loop body
LE: loop exit
PB: predicated region body
PF: predicated region fallthrough
CT: control target
= control target key end

     0   :  { %11 = vsyncpa [#allocation3], 0  ;;  %s1398_s0 = inlined_call_operand.vmem [shape: f32[2,8,32], index: 0, kind: input, shape index: {}]   ;;  %s1399_s1 = inlined_call_operand.vmem [shape: f32[32,96], index: 1, kind: input, shape index: {}]   ;;  %s1400_s2 = inlined_call_operand.vmem [shape: f32[64,32], index: 2, kind: input, shape index: {}]   ;;  %s1401_s3 = inlined_call_operand.vmem [shape: f32[1,32], index: 3, kind: input, shape index: {}]   ;;  %s1402_s4 = inlined_call_operand.vmem [shape: f32[1,32], index: 4, kind: input, shape index: {}]   ;;  %s1403_s5 = inlined_call_operand.vmem [shape: f32[2,16], index: 5, kind: input, shape index: {}]   ;;  %s1404_s6 = inlined_call_operand.hbm [shape: f32[2,8,32], index: 6, kind: output, shape index: {}]  }
   0x1   :  { %13 = vsyncpa [#allocation3 + $0x1], 0  ;;  %s1189_s21 = smov 0   ;;  %s1191_s22 = smov 0  }
   0x2   :  { %s1193_s23 = smov 0   ;;  %s1195_s24 = smov 0  }
   0x3 LB: > { %s1210_s25 = sadd.s32 4294967295, %s1140_s24   ;;  %s865_s26 = sadd.s32 4294967294, %s1140_s24   ;;  %s1140_s24 = sphi %s1195_s24, %s1410_s24   ;;  %s1136_s23 = sphi %s1193_s23, %s1409_s23   ;;  %s1132_s22 = sphi %s1191_s22, %s1408_s22   ;;  %s1128_s21 = sphi %s1189_s21, %s1407_s21  }
   0x4   : > { %s1214_s27 = sadd.s32 1, %s1140_s24   ;;  %s157_s28 = sadd.s32 1, %s1136_s23 }
   0x5   : > { %s154_s29 = ssub.s32 %s1140_s24, %s1214_s27  ;;  %p167_p0 = scmp.ne.s32.totalorder %s1136_s23, %s1132_s22 }
   0x6   : > { %p155_p1 = scmp.eq.s32.totalorder %s154_s29, 0  ;;  %p168_p2 = scmp.eq.s32.totalorder %s1210_s25, 1 }
   0x7   : > { %p173_p3 = scmp.ne.s32.totalorder %s1132_s22, %s1128_s21  ;;  %p174_p4 = scmp.eq.s32.totalorder %s865_s26, 1 }
   0x8   : > { %s1225_s30 = scalar_select %p155_p1, %s1136_s23, %s157_s28  }
   0x9   : > { %p1227_p5 = por %p168_p2, %p167_p0  ;;  %p1231_p6 = por %p174_p4, %p173_p3 }
   0xa   : > { %p868_p7 = scmp.ge.s32.totalorder %s1140_s24, 1  ;;  %p214_p8 = scmp.lt.s32.totalorder %s1140_s24, 3 }
   0xc   : > { %p215_p9 = pnand %p868_p7, %p214_p8 }
   0xd   : > { %p243_p10 = scmp.lt.s32.totalorder (!%p215_p9), %s1210_s25, 1  ;;  %vm250_vm0 = vcmask (!%p215_p9), 261120   ;;  %v272_v7 = vld [vmem:[%s1399_s1] sm:$0xff] (!%p215_p9)  ;;  %v273_v8 = vld [vmem:[%s1399_s1 + $0x8] sm:$0xff] (!%p215_p9)  ;;  %v274_v9 = vld [vmem:[%s1399_s1 + $0x10] sm:$0xff] (!%p215_p9)  ;;  %v1142_v10 = vmov (!%p215_p9), 0.0|0.0  }
   0xe   : > { %218 = sbr.rel (%p215_p9) target bundleno = 2242 (0x8c2), region = 44  ;;  %966 = vmatprep.subr.bf16.mxu0 (!%p215_p9), %v1142_v10  ;;  %v967_v11 = vpack.c.bf16 (!%p215_p9), %v273_v8, %v272_v7  ;;  %v275_v12 = vld [vmem:[%s1399_s1 + $0x18] sm:$0xff] (!%p215_p9)  ;;  %vm1143_vm1 = vmmov (!%p215_p9), 0   ;;  %v1144_v13 = vmov (!%p215_p9), 0.0   ;;  %v871_v19 = vld [vmem:[%s1401_s3] ss:$0 sm:$0xff] (!%p215_p9) }
   0xf   : > { %924 = vmatprep.mubr.msk.f32.mxu0 (!%p215_p9), %vm1143_vm1, %v1144_v13  ;;  %v970_v14 = vpack.c.bf16 (!%p215_p9), %v275_v12, %v274_v9  ;;  %s1147_s11 = smov (!%p215_p9), 112   ;;  %s1148_s12 = smov (!%p215_p9), 80   ;;  %v349_v25 = vld [vmem:[%s1403_s5] sm:$0x1] (!%p215_p9)  ;;  %vm356_vm2 = vcmask (!%p215_p9), 1040384   ;;  %vm377_vm3 = vcmask (!%p215_p9), 130048   ;;  %v525_v12 = vlaneseq (!%p215_p9) }
  0x10   : > { %968 = vmatpush3.bf16.msra.mxu0 (!%p215_p9), %v967_v11  ;;  %vm973_vm4 = vmpackc.low (!%p215_p9), %vm377_vm3, %vm377_vm3  ;;  %s1149_s15 = smov (!%p215_p9), 48   ;;  %vm1150_vm6 = vmmov (!%p215_p9), 1   ;;  %s1151_s20 = smov (!%p215_p9), 16   ;;  %vm687_vm8 = vcmask (!%p215_p9), 392192   ;;  %vm697_vm9 = vcmask (!%p215_p9), 523264  }
  0x11   : > { %969 = vmatprep.subr.bf16.mxu0 (!%p215_p9), %v1142_v10  ;;  %vm979_vm7 = vmpackc.low (!%p215_p9), %vm356_vm2, %vm1150_vm6  ;;  %s1152_s26 = smov (!%p215_p9), 32  }
  0x14   : > { %971 = vmatpush3.bf16.msra.mxu0 (!%p215_p9), %v970_v14  ;;  %v526_v14 = vand.u32 (!%p215_p9), 127, %v525_v12 }
  0x15   : > { %s244_s9 = scalar_select %p243_p10, %s1210_s25, 1 }
  0x16   : > { %vm527_vm5 = vcmp.lt.s32.totalorder %v526_v14, 9 }
  0x17   : > { %s870_s10 = sshll.u32 %s244_s9, 3  ;;  %s1145_s9 = smov 96  }
  0x18   : > { %s246_s13 = scalar_lea.vmem %s1398_s0, %s870_s10  ;;  %s1146_s10 = smov 64  }
  0x19   : > { %v247_v0 = vld [vmem:[%s246_s13] sm:$0xff] }
  0x1a   : > { %v251_v1 = vsel %vm250_vm0, %v247_v0, 0.0 }
  0x1b   : > { %252 = vadd.xlane.f32.xlu0 %v251_v1 }
  0xa8   : > { %v253_v2 = vpop.xlane.xlu0 %252 }
  0xa9   : > { %v255_v3 = vmul.f32 0.03125, %v253_v2 }
  0xab   : > { %v256_v4 = vsub.f32 %v247_v0, %v255_v3 }
  0xad   : > { %v257_v5 = vmul.f32 %v256_v4, %v256_v4 }
  0xaf   : > { %v258_v6 = vsel %vm250_vm0, %v257_v5, 0.0 }
  0xb0   : > { %259 = vadd.xlane.f32.xlu0 %v258_v6 }
 0x13d   : > { %v260_v15 = vpop.xlane.xlu0 %259 }
 0x13e   : > { %v261_v16 = vmul.f32 0.03125, %v260_v15 }
 0x140   : > { %v262_v17 = vadd.f32 1e-05, %v261_v16 }
 0x142   : > { %1046 = vrsqrt.f32 %v262_v17 }
 0x14c   : > { %v1047_v18 = vpop.eup %1046 }
 0x14d   : > { %v264_v20 = vmul.f32 %v1047_v18, %v256_v4 }
 0x14f   : > { %v271_v21 = vmul.f32 %v871_v19, %v264_v20 }
 0x151   : > { %925 = vmatmul.mubr.msk.f32.vlgmr.msra.gmra.mrb[0].mxu0 %vm250_vm0, %v271_v21 }
 0x224   : > { %v1264_v22 = vpop.f32.mrb[0].mxu0 }
 0x225   : > { %367 = vrot.lane.b32.xlu0 %v1264_v22, %s1145_s9  ;;  %v926_v23 = vpop.f32.mrb[1].mxu0  ;;  %v352_v24 = vrot.slane %v1264_v22, 7  ;;  %v373_v33 = vmul.f32 %v1264_v22, %v1264_v22 }
 0x227   : > { %353 = vrot.lane.b32.xlu1 %v352_v24, %s1146_s10  ;;  %v378_v36 = vsel %vm377_vm3, %v373_v33, 0.0  ;;  %s887_s10 = sshll.u32 %s1210_s25, 7  ;;  %s1153_s25 = smov [#allocation2]  }
 0x228   : > { %s1355_s16 = scalar_lea.hbm %s1404_s6, %s887_s10  ;;  %s1082_s19 = sshll.u32 %s1153_s25, 4  ;;  %s1083_s19 = int_to_ptr.vmem [resolvable:$false] %s1082_s19 }
 0x22b   : > { %364 = vrot.lane.b32.xlu1 %v1264_v22, %s1147_s11 }
 0x22f   : > { %370 = vrot.lane.b32.xlu1 %v1264_v22, %s1148_s12 }
 0x297   : > { %v368_v37 = vpop.permute.xlu0 %367 }
 0x298   : > { %v375_v38 = vmul.f32 %v368_v37, %v368_v37 }
 0x299   : > { %v354_v26 = vpop.permute.xlu1 %353 }
 0x29a   : > { %v357_v27 = vsel %vm356_vm2, %v349_v25, %v354_v26  ;;  %v358_v28 = vsel %vm356_vm2, %v354_v26, 0.0  ;;  %v384_v42 = vsel %vm377_vm3, %v375_v38, 0.0 }
 0x29b   : > { %v407_v29 = vmul.f32 %v358_v28, %v358_v28  ;;  %v406_v30 = vmul.f32 %v357_v27, %v357_v27 }
 0x29d   : > { %v411_v31 = vsel %vm377_vm3, %v407_v29, 0.0  ;;  %v408_v32 = vsel %vm377_vm3, %v406_v30, 0.0  ;;  %v365_v34 = vpop.permute.xlu1 %364 }
 0x29e   : > { %412 = vadd.xlane.f32.xlu0 %v411_v31  ;;  %409 = vadd.xlane.f32.xlu1 %v408_v32  ;;  %v374_v35 = vmul.f32 %v365_v34, %v365_v34 }
 0x2a0   : > { %v381_v39 = vsel %vm377_vm3, %v374_v35, 0.0 }
 0x2a1   : > { %v371_v40 = vpop.permute.xlu1 %370 }
 0x2a2   : > { %379 = vadd.xlane.f32.xlu1 %v378_v36  ;;  %v376_v41 = vmul.f32 %v371_v40, %v371_v40 }
 0x2a4   : > { %v387_v43 = vsel %vm377_vm3, %v376_v41, 0.0 }
 0x2a6   : > { %382 = vadd.xlane.f32.xlu1 %v381_v39 }
 0x2aa   : > { %385 = vadd.xlane.f32.xlu1 %v384_v42 }
 0x2ae   : > { %388 = vadd.xlane.f32.xlu1 %v387_v43 }
 0x32b   : > { %v413_v44 = vpop.xlane.xlu0 %412  ;;  %v410_v45 = vpop.xlane.xlu1 %409 }
 0x32c   : > { %v415_v46 = vmax.f32 %v413_v44, 1e-24  ;;  %v414_v47 = vmax.f32 %v410_v45, 1e-24 }
 0x32e   : > { %1048 = vrsqrt.f32 %v415_v46 }
 0x32f   : > { %1050 = vrsqrt.f32 %v414_v47  ;;  %v380_v48 = vpop.xlane.xlu1 %379 }
 0x330   : > { %v390_v49 = vmax.f32 %v380_v48, 1e-24 }
 0x332   : > { %1052 = vrsqrt.f32 %v390_v49 }
 0x333   : > { %v383_v50 = vpop.xlane.xlu1 %382 }
 0x334   : > { %v391_v51 = vmax.f32 %v383_v50, 1e-24 }
 0x336   : > { %1054 = vrsqrt.f32 %v391_v51 }
 0x337   : > { %v386_v52 = vpop.xlane.xlu1 %385 }
 0x338   : > { %v1049_v53 = vpop.eup %1048  ;;  %v392_v54 = vmax.f32 %v386_v52, 1e-24  ;;  %v350_v52 = vld [vmem:[%s1403_s5 + $0x1] sm:$0x1] }
 0x339   : > { %v1051_v55 = vpop.eup %1050  ;;  %v419_v56 = vmul.f32 %v1049_v53, %v358_v28 }
 0x33a   : > { %1056 = vrsqrt.f32 %v392_v54  ;;  %v418_v57 = vmul.f32 %v1051_v55, %v357_v27 }
 0x33b   : > { %v389_v58 = vpop.xlane.xlu1 %388  ;;  %v421_v59 = vmul.f32 4.0, %v419_v56 }
 0x33c   : > { %v1053_v60 = vpop.eup %1052  ;;  %v393_v61 = vmax.f32 %v389_v58, 1e-24  ;;  %v420_v62 = vmul.f32 4.0, %v418_v57 }
 0x33d   : > { %v398_v63 = vmul.f32 %v1053_v60, %v1264_v22 }
 0x33e   : > { %1058 = vrsqrt.f32 %v393_v61  ;;  %v972_v0 = vpack.c.bf16 %v421_v59, %v420_v62  ;;  %v689_v62 = vld [vmem:[%s1400_s2] sm:$0xff] }
 0x33f   : > { %v402_v1 = vmul.f32 4.0, %v398_v63  ;;  %v690_v63 = vld [vmem:[%s1400_s2 + $0x8] sm:$0xff] }
 0x340   : > { %v1055_v2 = vpop.eup %1054  ;;  %974 = vmatprep.subr.msk.bf16.mxu1 %vm973_vm4, %v972_v0 }
 0x341   : > { %977 = vmatpush3.bf16.xpose.msk.msra.mxu1 %vm973_vm4, %v972_v0  ;;  %931 = vmatprep.mubr.msk.f32.mxu1 %vm377_vm3, %v402_v1  ;;  %v399_v3 = vmul.f32 %v1055_v2, %v365_v34  ;;  %v691_v0 = vld [vmem:[%s1400_s2 + $0x10] sm:$0xff]  ;;  %v985_v1 = vpack.c.bf16 %v690_v63, %v689_v62  ;;  %v692_v2 = vld [vmem:[%s1400_s2 + $0x18] sm:$0xff] }
 0x342   : > { %984 = vmatprep.subr.bf16.mxu1 %v1142_v10 }
 0x343   : > { %v403_v6 = vmul.f32 4.0, %v399_v3  ;;  %v988_v3 = vpack.c.bf16 %v692_v2, %v691_v0 }
 0x344   : > { %v1057_v4 = vpop.eup %1056 }
 0x345   : > { %v400_v5 = vmul.f32 %v1057_v4, %v368_v37  ;;  %v693_v4 = vld [vmem:[%s1400_s2 + $0x20] sm:$0xff] }
 0x347   : > { %v404_v7 = vmul.f32 4.0, %v400_v5  ;;  %v694_v5 = vld [vmem:[%s1400_s2 + $0x28] sm:$0xff] }
 0x348   : > { %v1059_v8 = vpop.eup %1058  ;;  %932 = vmatmul.mubr.msk.f32.vlgmr.msra.gmra.mrb[0].mxu1 %vm377_vm3, %v403_v6  ;;  %v991_v6 = vpack.c.bf16 %v694_v5, %v693_v4 }
 0x349   : > { %934 = vmatprep.mubr.msk.f32.mxu1 %vm377_vm3, %v404_v7  ;;  %v401_v9 = vmul.f32 %v1059_v8, %v371_v40  ;;  %986 = vmatpush3.bf16.msra.mxu1 %v985_v1  ;;  %v695_v7 = vld [vmem:[%s1400_s2 + $0x30] sm:$0xff]  ;;  %v696_v8 = vld [vmem:[%s1400_s2 + $0x38] sm:$0xff] }
 0x34a   : > { %987 = vmatprep.subr.bf16.mxu1 %v1142_v10 }
 0x34b   : > { %v405_v11 = vmul.f32 4.0, %v401_v9  ;;  %v994_v9 = vpack.c.bf16 %v696_v8, %v695_v7 }
 0x34d   : > { %935 = vmatmul.mubr.msk.f32.gmra.mrb[2].mxu1 %vm377_vm3, %v405_v11 }
 0x34e   : > { %963 = vmatprep.mubr.msk.f32.mxu1 %vm1143_vm1, %v1144_v13  ;;  %989 = vmatpush3.bf16.msra.mxu1 %v988_v3 }
 0x34f   : > { %990 = vmatprep.subr.bf16.mxu1 %v1142_v10 }
 0x352   : > { %992 = vmatpush3.bf16.msra.mxu1 %v991_v6 }
 0x353   : > { %993 = vmatprep.subr.bf16.mxu1 %v1142_v10 }
 0x356   : > { %995 = vmatpush3.bf16.msra.mxu1 %v994_v9 }
 0x41b   : > { %v933_v15 = vpop.f32.mrb[0].mxu1 }
 0x41c   : > { %v529_v16 = vsel %vm527_vm5, %v933_v15, -1e+30  ;;  %v506_v17 = vpop.f32.mrb[1].mxu1 }
 0x41d   : > { %v528_v18 = vsel %vm527_vm5, %v506_v17, -1e+30  ;;  %v535_v19 = vsel %vm377_vm3, %v529_v16, -inf }
 0x41e   : > { %536 = vmax.xlane.f32.xlu1 %v535_v19  ;;  %v532_v20 = vsel %vm377_vm3, %v528_v18, -inf }
 0x41f   : > { %533 = vmax.xlane.f32.xlu0 %v532_v20 }
 0x420   : > { %v936_v21 = vpop.f32.mrb[2].mxu1 }
 0x421   : > { %v531_v23 = vsel %vm527_vm5, %v936_v21, -1e+30  ;;  %v516_v25 = vpop.f32.mrb[3].mxu1 }
 0x422   : > { %v530_v26 = vsel %vm527_vm5, %v516_v25, -1e+30  ;;  %v541_v27 = vsel %vm377_vm3, %v531_v23, -inf }
 0x423   : > { %542 = vmax.xlane.f32.xlu1 %v541_v27  ;;  %v538_v13 = vsel %vm377_vm3, %v530_v26, -inf }
 0x424   : > { %539 = vmax.xlane.f32.xlu0 %v538_v13 }
 0x4ab   : > { %v537_v28 = vpop.xlane.xlu1 %536 }
 0x4ac   : > { %v545_v29 = vsub.f32 %v529_v16, %v537_v28  ;;  %v534_v30 = vpop.xlane.xlu0 %533 }
 0x4ad   : > { %v544_v31 = vsub.f32 %v528_v18, %v534_v30 }
 0x4ae   : > { %v550_v32 = vmul.f32 1.442695, %v545_v29 }
 0x4af   : > { %v548_v33 = vmul.f32 1.442695, %v544_v31 }
 0x4b0   : > { %1060 = vpow2.f32 %v550_v32  ;;  %v543_v34 = vpop.xlane.xlu1 %542 }
 0x4b1   : > { %1062 = vpow2.f32 %v548_v33  ;;  %v547_v35 = vsub.f32 %v531_v23, %v543_v34  ;;  %v540_v36 = vpop.xlane.xlu0 %539  ;;  %v885_v34 = vld [vmem:[%s1402_s4] ss:$0 sm:$0xff] }
 0x4b2   : > { %v546_v37 = vsub.f32 %v530_v26, %v540_v36 }
 0x4b3   : > { %v554_v38 = vmul.f32 1.442695, %v547_v35 }
 0x4b4   : > { %v552_v39 = vmul.f32 1.442695, %v546_v37 }
 0x4b5   : > { %1064 = vpow2.f32 %v554_v38 }
 0x4b6   : > { %1066 = vpow2.f32 %v552_v39 }
 0x4ba   : > { %v1061_v40 = vpop.eup %1060 }
 0x4bb   : > { %v1063_v41 = vpop.eup %1062  ;;  %v559_v42 = vsel %vm377_vm3, %v1061_v40, 0.0 }
 0x4bc   : > { %560 = vadd.xlane.f32.xlu1 %v559_v42  ;;  %v556_v43 = vsel %vm377_vm3, %v1063_v41, 0.0 }
 0x4bd   : > { %557 = vadd.xlane.f32.xlu0 %v556_v43 }
 0x4bf   : > { %v1065_v44 = vpop.eup %1064 }
 0x4c0   : > { %v1067_v45 = vpop.eup %1066  ;;  %v565_v46 = vsel %vm377_vm3, %v1065_v44, 0.0 }
 0x4c1   : > { %566 = vadd.xlane.f32.xlu1 %v565_v46  ;;  %v562_v47 = vsel %vm377_vm3, %v1067_v45, 0.0 }
 0x4c2   : > { %563 = vadd.xlane.f32.xlu0 %v562_v47 }
 0x4d8   : > { %359 = vrot.lane.b32.xlu0 %v352_v24, %s1149_s15 }
 0x549   : > { %v561_v48 = vpop.xlane.xlu1 %560 }
 0x54a   : > { %v558_v49 = vpop.xlane.xlu0 %557 }
 0x54b   : > { %1068 = vrcp.f32 %v558_v49 }
 0x54c   : > { %1070 = vrcp.f32 %v561_v48 }
 0x54e   : > { %v567_v50 = vpop.xlane.xlu1 %566 }
 0x54f   : > { %1072 = vrcp.f32 %v567_v50  ;;  %v564_v51 = vpop.xlane.xlu0 %563 }
 0x550   : > { %1074 = vrcp.f32 %v564_v51 }
 0x553   : > { %v360_v53 = vpop.permute.xlu0 %359 }
 0x554   : > { %v362_v54 = vsel %vm356_vm2, %v350_v52, %v360_v53 }
 0x555   : > { %v1069_v22 = vpop.eup %1068  ;;  %v978_v24 = vpack.c.bf16 %v360_v53, %v362_v54 }
 0x556   : > { %v1071_v55 = vpop.eup %1070  ;;  %v569_v56 = vmul.f32 %v1069_v22, %v1063_v41 }
 0x557   : > { %980 = vmatprep.subr.msk.bf16.mxu0 %vm979_vm7, %v978_v24  ;;  %v571_v58 = vmul.f32 %v1071_v55, %v1061_v40 }
 0x558   : > { %941 = vmatprep.mubr.msk.f32.mxu0 %vm377_vm3, %v569_v56  ;;  %983 = vmatpush3.bf16.msk.msra.mxu0 %vm979_vm7, %v978_v24 }
 0x559   : > { %v1073_v57 = vpop.eup %1072 }
 0x55a   : > { %v1075_v59 = vpop.eup %1074  ;;  %v575_v61 = vmul.f32 %v1073_v57, %v1065_v44 }
 0x55b   : > { %942 = vmatmul.mubr.msk.f32.vlgmr.msra.gmra.mrb[2].mxu0 %vm377_vm3, %v571_v58  ;;  %v573_v60 = vmul.f32 %v1075_v59, %v1067_v45 }
 0x55d   : > { %944 = vmatprep.mubr.msk.f32.mxu0 %vm377_vm3, %v573_v60 }
 0x55f   : > { %945 = vmatmul.mubr.msk.f32.gmra.mrb[4].mxu0 %vm377_vm3, %v575_v61 }
 0x62e   : > { %v943_v11 = vpop.f32.mrb[2].mxu0 }
 0x62f   : > { %674 = vrot.lane.b32.xlu1 %v943_v11, %s1151_s20  ;;  %v654_v12 = vpop.f32.mrb[3].mxu0  ;;  %s1084_s20 = scalar_lea.vmem %s1083_s19, 256 }
 0x632   : > { %v946_v14 = vpop.f32.mrb[4].mxu0 }
 0x633   : > { %682 = vrot.lane.b32.xlu0 %v946_v14, %s1149_s15  ;;  %v664_v15 = vpop.f32.mrb[5].mxu0  ;;  %s240_s15 = sand.u32 1, %s1132_s22  }
 0x634   : > { %678 = vrot.lane.b32.xlu1 %v664_v15, %s1152_s26  ;;  %s869_s28 = sshll.u32 %s240_s15, 3  ;;  %s793_s17 = scalar_lea.sflag [#allocation3], %s240_s15 }
 0x635   : > { %s242_s11 = scalar_lea.vmem [#allocation2], %s869_s28 }
 0x636   : > { %s806_s12 = sshll.u32 %s242_s11, 4  ;;  %s1357_s12 = int_to_ptr.vmem [resolvable:$true] %s806_s12 }
 0x637   : > { %s1078_s18 = scalar_lea.vmem %s1357_s12, 128  ;;  %p1085_p0 = scmp.lt.s32.totalorder %s1357_s12, %s1083_s19 }
 0x638   : > { %p1079_p11 = scmp.ne.s32.totalorder %s1357_s12, %s1078_s18  ;;  %p1086_p1 = scmp.lt.s32.totalorder %s1084_s20, %s1078_s18 }
 0x63a   : > { %p1080_p12 = pnand %p1079_p11, %p1227_p5  ;;  %p1087_p2 = por %p1086_p1, %p1085_p0 }
 0x63c   : > { %p1081_p13 = pneg %p1080_p12 }
 0x63e   : > { %p1088_p3 = pnand %p1087_p2, %p1081_p13 }
 0x6a1   : > { %v675_v10 = vpop.permute.xlu1 %674 }
 0x6a2   : > { %v685_v16 = vsel %vm377_vm3, %v654_v12, %v675_v10 }
 0x6a5   : > { %v683_v18 = vpop.permute.xlu0 %682 }
 0x6a6   : > { %v679_v17 = vpop.permute.xlu1 %678 }
 0x6a7   : > { %v686_v19 = vsel %vm250_vm0, %v685_v16, %v679_v17 }
 0x6a8   : > { %v688_v20 = vsel %vm687_vm8, %v686_v19, %v683_v18 }
 0x6a9   : > { %964 = vmatmul.mubr.msk.f32.vlgmr.msra.gmra.mrb[4].mxu1 %vm697_vm9, %v688_v20 }
 0x77c   : > { %v767_v21 = vpop.f32.mrb[4].mxu1 }
 0x77d   : > { %v965_v23 = vpop.f32.mrb[5].mxu1  ;;  %v771_v25 = vsel %vm250_vm0, %v767_v21, 0.0 }
 0x77e   : > { %772 = vadd.xlane.f32.xlu1 %v771_v25 }
 0x80b   : > { %v773_v26 = vpop.xlane.xlu1 %772 }
 0x80c   : > { %v774_v27 = vmul.f32 0.03125, %v773_v26 }
 0x80e   : > { %v775_v13 = vsub.f32 %v767_v21, %v774_v27 }
 0x810   : > { %v776_v28 = vmul.f32 %v775_v13, %v775_v13 }
 0x812   : > { %v777_v29 = vsel %vm250_vm0, %v776_v28, 0.0 }
 0x813   : > { %778 = vadd.xlane.f32.xlu0 %v777_v29 }
 0x8a0   : > { %v779_v30 = vpop.xlane.xlu0 %778 }
 0x8a1   : > { %v780_v31 = vmul.f32 0.03125, %v779_v30 }
 0x8a3   : > { %v781_v32 = vadd.f32 1e-05, %v780_v31 }
 0x8a5   : > { %1076 = vrsqrt.f32 %v781_v32 }
 0x8af   : > { %v1077_v33 = vpop.eup %1076 }
 0x8b0   : > { %v783_v35 = vmul.f32 %v1077_v33, %v775_v13 }
 0x8b2   : > { %v790_v36 = vmul.f32 %v885_v34, %v783_v35 }
 0x8b4   : > { %791 = vst.msk [vmem:[%s242_s11] sm:$0xff] %vm250_vm0, %v790_v36 }
 0x8b5   : > { %1091 = shalt.err (!%p1088_p3)
}
 0x8b6   : > { %s1092_s26 = scalar_lea.hbm %s1355_s16, 128  ;;  %s1096_s29 = scalar_lea.hbm %s1404_s6, 256 }
 0x8b7   : > { %p1093_p4 = scmp.ne.s32.totalorder %s1355_s16, %s1092_s26  ;;  %p1097_p9 = scmp.lt.u32.totalorder %s1355_s16, %s1404_s6 }
 0x8b8   : > { %p1098_p10 = scmp.lt.u32.totalorder %s1096_s29, %s1092_s26  ;;  %p1100_p12 = scmp.lt.u32.totalorder %s1092_s26, %s1355_s16 }
 0x8b9   : > { %p1094_p7 = pnand %p1093_p4, %p1227_p5 }
 0x8ba   : > { %p1099_p11 = por %p1098_p10, %p1097_p9 }
 0x8bb   : > { %p1095_p8 = pneg %p1094_p7 }
 0x8bc   : > { %p1101_p13 = por %p1100_p12, %p1099_p11 }
 0x8be   : > { %p1102_p0 = pnand %p1101_p13, %p1095_p8 }
 0x8c0   : > { %1105 = shalt.err (!%p1102_p0)
}
 0x8c1   : > { %996 = dma.vmem_to_hbm [thread:$0]  (%p1227_p5), %s1357_s12, 128, %s1355_s16, %s793_s17  }
 0x8c2 PF: > { %p1002_p1 = scmp.ge.s32.totalorder %s1140_s24, 2  ;;  %s818_s11 = sand.u32 1, %s1128_s21  }
 0x8c3   : > { %s819_s13 = scalar_lea.sflag [#allocation3], %s818_s11 }
 0x8c4   : > { %p999_p2 = pnand %p1002_p1, %p1231_p6 }
 0x8c6   : > { %1123 = dma.done.wait (!%p999_p2), %s819_s13, 128  }
 0x8c7   : > { %1125 = vsyncadd (!%p999_p2), %s819_s13, 4294967168  ;;  %p16_p3 = scmp.ge.s32.totalorder %s1214_s27, 4   ;;  %s1407_s21 = smov %s1132_s22 }
 0x8c8   : > { %s1408_s22 = smov %s1136_s23  ;;  %s1409_s23 = smov %s1225_s30 }
 0x8c9   : > { %s1410_s24 = smov %s1214_s27  ;;  %18 = sbr.rel (!%p16_p3) target bundleno = 3 (0x3), region = 79 }
 0x8d0   :  { %824 = vsyncpa [#allocation3], 1 }
 0x8d1   :  { %826 = vsyncpa [#allocation3 + $0x1], 1 }

</bundles_post_ra>
